<compile_context>
chip_gen: v6e
topology: v6e:2x2x1
jax: 0.10.0
libtpu: 0.0.40
codegen_flags: <defaults>
</compile_context>

<pallas_src>
import functools

import jax
import jax.numpy as jnp
from jax.experimental import pallas as pl
from jax.experimental.pallas import tpu as pltpu


def _plane_x_stats_kernel(x_ref, sum_ref, sq_ref, s_sum, s_sq):
    """Accumulate per-row (= per (b, c) plane) sum and sum-of-squares of x across HW tiles."""
    t = pl.program_id(0)

    @pl.when(t == 0)
    def _():
        s_sum[...] = jnp.zeros_like(s_sum)
        s_sq[...] = jnp.zeros_like(s_sq)

    x = x_ref[...].astype(jnp.float32)          # (BC, tile); zero-padded lanes are harmless here
    s_sum[...] += jnp.sum(x, axis=-1, keepdims=True)
    s_sq[...] += jnp.sum(x * x, axis=-1, keepdims=True)

    @pl.when(t == pl.num_programs(0) - 1)
    def _():
        sum_ref[...] = s_sum[...]
        sq_ref[...] = s_sq[...]


def _plane_y_stats_kernel(x_ref, scale_ref, shift_ref, sumy_ref, maxy_ref,
                          s_sum, s_max, *, slope, valid_hw, tile):
    """y = leaky_relu(x*scale + shift) computed per tile (never materialized);
    accumulate per-plane sum(y) and max(y)."""
    t = pl.program_id(0)

    @pl.when(t == 0)
    def _():
        s_sum[...] = jnp.zeros_like(s_sum)
        s_max[...] = jnp.full_like(s_max, -jnp.inf)

    x = x_ref[...].astype(jnp.float32)
    y = x * scale_ref[...] + shift_ref[...]          # folded BN: one FMA pattern per element
    y = jnp.where(y >= 0, y, slope * y)              # LeakyReLU (negative_slope = 0.01)

    if valid_hw is not None:
        lane = jax.lax.broadcasted_iota(jnp.int32, y.shape, 1) + t * tile
        valid = lane < valid_hw
        s_sum[...] += jnp.sum(jnp.where(valid, y, 0.0), axis=-1, keepdims=True)
        s_max[...] = jnp.maximum(
            s_max[...], jnp.max(jnp.where(valid, y, -jnp.inf), axis=-1, keepdims=True))
    else:
        s_sum[...] += jnp.sum(y, axis=-1, keepdims=True)
        s_max[...] = jnp.maximum(s_max[...], jnp.max(y, axis=-1, keepdims=True))

    @pl.when(t == pl.num_programs(0) - 1)
    def _():
        sumy_ref[...] = s_sum[...]
        maxy_ref[...] = s_max[...]


def _bias_add_kernel(x_ref, bias_ref, o_ref):
    o_ref[...] = (x_ref[...].astype(jnp.float32) + bias_ref[...]).astype(o_ref.dtype)


def _pick_lane_tile(hw_padded, max_tile=1024):
    tile = 128
    for t in (256, 512, 1024):
        if t <= max_tile and hw_padded % t == 0:
            tile = t
    return tile


def global_bias_block(x, gamma, beta, weight, bias_lin, *, eps=1e-5, slope=0.01):
    """x: (B, C, H, W) (NCHW, same layout as PyTorch). Returns (B, C, H, W)."""
    B, C, H, W = x.shape
    HW = H * W
    BC = B * C

    # Lane-dense 2-D slab: sublanes = B*C planes, lanes = flattened spatial.
    x2 = x.reshape(BC, HW)
    hw_p = ((HW + 127) // 128) * 128
    if hw_p != HW:
        x2 = jnp.pad(x2, ((0, 0), (0, hw_p - HW)))   # zero pad; masked where it matters (pass 2)
    tile = _pick_lane_tile(hw_p)
    n_tiles = hw_p // tile

    vmem_limit = 32 * 1024 * 1024
    itemsize = jnp.dtype(x.dtype).itemsize
    x_bytes = BC * hw_p * itemsize

    stat_shape = jax.ShapeDtypeStruct((BC, 1), jnp.float32)
    stat_spec = pl.BlockSpec((BC, 1), lambda t: (0, 0))      # constant index map -> VMEM resident
    x_spec = pl.BlockSpec((BC, tile), lambda t: (0, t))

    # ---- pass 1: per-plane sum / sum-of-squares of x (single sweep over x) ----
    sum_x, sq_x = pl.pallas_call(
        _plane_x_stats_kernel,
        out_shape=(stat_shape, stat_shape),
        grid=(n_tiles,),
        in_specs=[x_spec],
        out_specs=(stat_spec, stat_spec),
        scratch_shapes=[pltpu.VMEM((BC, 1), jnp.float32),
                        pltpu.VMEM((BC, 1), jnp.float32)],
        compiler_params=pltpu.CompilerParams(
            dimension_semantics=("arbitrary",), vmem_limit_bytes=vmem_limit),
        cost_estimate=pl.CostEstimate(flops=3 * BC * hw_p, transcendentals=0,
                                      bytes_accessed=x_bytes),
    )(x2)

    # ---- fold BatchNorm into per-channel scale/shift (tiny math on (C,) vectors) ----
    n = B * HW
    ch_sum = sum_x.reshape(B, C).sum(axis=0)
    ch_sq = sq_x.reshape(B, C).sum(axis=0)
    mean = ch_sum / n
    var = jnp.maximum(ch_sq / n - mean * mean, 0.0)          # biased variance, clamped (f32 accum)
    scale_c = gamma.astype(jnp.float32) * jax.lax.rsqrt(var + eps)
    shift_c = beta.astype(jnp.float32) - mean * scale_c
    scale_bc = jnp.tile(scale_c, B).reshape(BC, 1)           # row b*C+c -> scale[c]
    shift_bc = jnp.tile(shift_c, B).reshape(BC, 1)

    # ---- pass 2: per-plane sum / max of y = leaky_relu(x*scale + shift) ----
    valid_hw = HW if hw_p != HW else None
    sum_y, max_y = pl.pallas_call(
        functools.partial(_plane_y_stats_kernel, slope=slope, valid_hw=valid_hw, tile=tile),
        out_shape=(stat_shape, stat_shape),
        grid=(n_tiles,),
        in_specs=[x_spec, stat_spec, stat_spec],
        out_specs=(stat_spec, stat_spec),
        scratch_shapes=[pltpu.VMEM((BC, 1), jnp.float32),
                        pltpu.VMEM((BC, 1), jnp.float32)],
        compiler_params=pltpu.CompilerParams(
            dimension_semantics=("arbitrary",), vmem_limit_bytes=vmem_limit),
        cost_estimate=pl.CostEstimate(flops=5 * BC * hw_p, transcendentals=0,
                                      bytes_accessed=x_bytes),
    )(x2, scale_bc, shift_bc)

    # ---- tiny Linear(2C -> C) on (B, 2C) stats: single fused dot, deliberately left to XLA
    #      (a C=4 matmul pads to <1% of an MXU tile; a kernel here is pure overhead). ----
    means = (sum_y / HW).reshape(B, C)
    maxes = max_y.reshape(B, C)
    stats = jnp.concatenate([means, maxes], axis=1)                       # (B, 2C)
    bias_vec = stats @ weight.astype(jnp.float32).T + bias_lin.astype(jnp.float32)[None, :]
    bias_bc = bias_vec.reshape(BC, 1)                                     # row b*C+c -> bias[b, c]

    # ---- pass 3: parallel broadcast residual add (out = x + bias) ----
    out2 = pl.pallas_call(
        _bias_add_kernel,
        out_shape=jax.ShapeDtypeStruct((BC, hw_p), x.dtype),
        grid=(n_tiles,),
        in_specs=[x_spec, stat_spec],
        out_specs=pl.BlockSpec((BC, tile), lambda t: (0, t)),
        compiler_params=pltpu.CompilerParams(
            dimension_semantics=("parallel",), vmem_limit_bytes=vmem_limit),
        cost_estimate=pl.CostEstimate(flops=BC * hw_p, transcendentals=0,
                                      bytes_accessed=2 * x_bytes),
    )(x2, bias_bc)

    if hw_p != HW:
        out2 = out2[:, :HW]
    return out2.reshape(B, C, H, W)


def _reference(x, gamma, beta, weight, bias, *, eps=1e-5, slope=0.01):
    """Pure-JAX reference mirroring the PyTorch forward (training-mode BN stats)."""
    mu = jnp.mean(x, axis=(0, 2, 3), keepdims=True)
    var = jnp.mean((x - mu) ** 2, axis=(0, 2, 3), keepdims=True)
    y = (x - mu) * jax.lax.rsqrt(var + eps) * gamma[None, :, None, None] + beta[None, :, None, None]
    y = jnp.where(y >= 0, y, slope * y)
    plane_means = jnp.mean(y, axis=(-2, -1))      # (B, C)
    plane_maxes = jnp.max(y, axis=(-2, -1))       # (B, C)
    stats = jnp.concatenate([plane_means, plane_maxes], axis=1)  # (B, 2C)
    out = stats @ weight.T + bias                 # (B, C)
    return x + out[:, :, None, None]


# TODO(synk): torch.utils.checkpoint (gradient rematerialization) and BatchNorm running-stats
#             updates are training-time mechanisms with no effect on the forward output; omitted.

if __name__ == "__main__":
    key = jax.random.PRNGKey(0)
    B, C, H, W = 2, 4, 16, 16

    k_x, k_w = jax.random.split(key)
    x = jax.random.normal(k_x, (B, C, H, W), dtype=jnp.float32)

    # BatchNorm2d parameters: default PyTorch init (gamma=1, beta=0).
    gamma = jnp.ones((C,), dtype=jnp.float32)
    beta = jnp.zeros((C,), dtype=jnp.float32)

    # Linear(2C -> C): xavier_normal_ weight, zero bias (deterministic via PRNGKey(0)).
    fan_in, fan_out = 2 * C, C
    xavier_std = (2.0 / (fan_in + fan_out)) ** 0.5
    weight = xavier_std * jax.random.normal(k_w, (C, 2 * C), dtype=jnp.float32)
    bias = jnp.zeros((C,), dtype=jnp.float32)

    fn = jax.jit(global_bias_block)
    out = jax.block_until_ready(fn(x, gamma, beta, weight, bias))

    ref = _reference(x, gamma, beta, weight, bias)
    assert out.shape == (B, C, H, W)
    assert jnp.allclose(out, ref, atol=1e-4, rtol=1e-4), "mismatch vs reference"

    print("KERNEL_OK")
</pallas_src>

<mosaic_0001>
module attributes {stable_mosaic.version = 11 : i64} {
  func.func @_plane_x_stats_kernel(%arg0: i32, %arg1: memref<8x256xf32, #tpu.memory_space<vmem>>, %arg2: memref<8x1xf32, #tpu.memory_space<vmem>>, %arg3: memref<8x1xf32, #tpu.memory_space<vmem>>, %arg4: memref<8x1xf32, #tpu.memory_space<vmem>>, %arg5: memref<8x1xf32, #tpu.memory_space<vmem>>) attributes {dimension_semantics = [#tpu.dimension_semantics<arbitrary>], iteration_bounds = array<i64: 1>, scalar_prefetch = 0 : i64, scratch_operands = 2 : i64, tpu.core_type = #tpu.core_type<tc>, window_params = [{transform_indices = @transform_0, window_bounds = array<i64: 8, 256>}, {pipeline_mode = #tpu.pipeline_mode<synchronous>, transform_indices = @transform_1, window_bounds = array<i64: 8, 1>}, {pipeline_mode = #tpu.pipeline_mode<synchronous>, transform_indices = @transform_2, window_bounds = array<i64: 8, 1>}]} {
    %c0_i32 = arith.constant 0 : i32
    %0 = arith.cmpi eq, %arg0, %c0_i32 : i32
    %1 = arith.extui %0 : i1 to i32
    %c0_i32_0 = arith.constant 0 : i32
    %2 = arith.cmpi ne, %1, %c0_i32_0 : i32
    scf.if %2 {
      %cst_13 = arith.constant 0.000000e+00 : f32
      %18 = vector.broadcast %cst_13 : f32 to vector<8x1xf32>
      %c0_14 = arith.constant 0 : index
      %c0_15 = arith.constant 0 : index
      %19 = vector.load %arg4[%c0_14, %c0_15] : memref<8x1xf32, #tpu.memory_space<vmem>>, vector<8x1xf32>
      tpu.vector_store %arg4[%c0_14, %c0_15], %18 {strides = array<i32>} : memref<8x1xf32, #tpu.memory_space<vmem>>, vector<8x1xf32>,
      %cst_16 = arith.constant 0.000000e+00 : f32
      %20 = vector.broadcast %cst_16 : f32 to vector<8x1xf32>
      %c0_17 = arith.constant 0 : index
      %c0_18 = arith.constant 0 : index
      %21 = vector.load %arg5[%c0_17, %c0_18] : memref<8x1xf32, #tpu.memory_space<vmem>>, vector<8x1xf32>
      tpu.vector_store %arg5[%c0_17, %c0_18], %20 {strides = array<i32>} : memref<8x1xf32, #tpu.memory_space<vmem>>, vector<8x1xf32>,
    } else {
    }
    %c0 = arith.constant 0 : index
    %c0_1 = arith.constant 0 : index
    %3 = vector.load %arg1[%c0, %c0_1] : memref<8x256xf32, #tpu.memory_space<vmem>>, vector<8x256xf32>
    %c0_2 = arith.constant 0 : index
    %c0_3 = arith.constant 0 : index
    %4 = vector.load %arg4[%c0_2, %c0_3] : memref<8x1xf32, #tpu.memory_space<vmem>>, vector<8x1xf32>
    %cst = arith.constant dense<0.000000e+00> : vector<8xf32>
    %5 = vector.multi_reduction <add>, %3, %cst [1] : vector<8x256xf32> to vector<8xf32>
    %6 = vector.shape_cast %5 : vector<8xf32> to vector<8x1xf32>
    %7 = arith.addf %4, %6 : vector<8x1xf32>
    %c0_4 = arith.constant 0 : index
    %c0_5 = arith.constant 0 : index
    %8 = vector.load %arg4[%c0_4, %c0_5] : memref<8x1xf32, #tpu.memory_space<vmem>>, vector<8x1xf32>
    tpu.vector_store %arg4[%c0_4, %c0_5], %7 {strides = array<i32>} : memref<8x1xf32, #tpu.memory_space<vmem>>, vector<8x1xf32>,
    %c0_6 = arith.constant 0 : index
    %c0_7 = arith.constant 0 : index
    %9 = vector.load %arg5[%c0_6, %c0_7] : memref<8x1xf32, #tpu.memory_space<vmem>>, vector<8x1xf32>
    %10 = arith.mulf %3, %3 : vector<8x256xf32>
    %cst_8 = arith.constant dense<0.000000e+00> : vector<8xf32>
    %11 = vector.multi_reduction <add>, %10, %cst_8 [1] : vector<8x256xf32> to vector<8xf32>
    %12 = vector.shape_cast %11 : vector<8xf32> to vector<8x1xf32>
    %13 = arith.addf %9, %12 : vector<8x1xf32>
    %c0_9 = arith.constant 0 : index
    %c0_10 = arith.constant 0 : index
    %14 = vector.load %arg5[%c0_9, %c0_10] : memref<8x1xf32, #tpu.memory_space<vmem>>, vector<8x1xf32>
    tpu.vector_store %arg5[%c0_9, %c0_10], %13 {strides = array<i32>} : memref<8x1xf32, #tpu.memory_space<vmem>>, vector<8x1xf32>,
    %c0_i32_11 = arith.constant 0 : i32
    %15 = arith.cmpi eq, %arg0, %c0_i32_11 : i32
    %16 = arith.extui %15 : i1 to i32
    %c0_i32_12 = arith.constant 0 : i32
    %17 = arith.cmpi ne, %16, %c0_i32_12 : i32
    scf.if %17 {
      %c0_13 = arith.constant 0 : index
      %c0_14 = arith.constant 0 : index
      %18 = vector.load %arg4[%c0_13, %c0_14] : memref<8x1xf32, #tpu.memory_space<vmem>>, vector<8x1xf32>
      %c0_15 = arith.constant 0 : index
      %c0_16 = arith.constant 0 : index
      %19 = vector.load %arg2[%c0_15, %c0_16] : memref<8x1xf32, #tpu.memory_space<vmem>>, vector<8x1xf32>
      tpu.vector_store %arg2[%c0_15, %c0_16], %18 {strides = array<i32>} : memref<8x1xf32, #tpu.memory_space<vmem>>, vector<8x1xf32>,
      %c0_17 = arith.constant 0 : index
      %c0_18 = arith.constant 0 : index
      %20 = vector.load %arg5[%c0_17, %c0_18] : memref<8x1xf32, #tpu.memory_space<vmem>>, vector<8x1xf32>
      %c0_19 = arith.constant 0 : index
      %c0_20 = arith.constant 0 : index
      %21 = vector.load %arg3[%c0_19, %c0_20] : memref<8x1xf32, #tpu.memory_space<vmem>>, vector<8x1xf32>
      tpu.vector_store %arg3[%c0_19, %c0_20], %20 {strides = array<i32>} : memref<8x1xf32, #tpu.memory_space<vmem>>, vector<8x1xf32>,
    } else {
    }
    return
  }
  func.func @transform_0(%arg0: i32) -> (i32, i32) {
    %c0_i32 = arith.constant 0 : i32
    %c0_i32_0 = arith.constant 0 : i32
    return %c0_i32, %arg0 : i32, i32
  }
  func.func @transform_1(%arg0: i32) -> (i32, i32) {
    %c0_i32 = arith.constant 0 : i32
    %c0_i32_0 = arith.constant 0 : i32
    %c0_i32_1 = arith.constant 0 : i32
    return %c0_i32, %c0_i32_0 : i32, i32
  }
  func.func @transform_2(%arg0: i32) -> (i32, i32) {
    %c0_i32 = arith.constant 0 : i32
    %c0_i32_0 = arith.constant 0 : i32
    %c0_i32_1 = arith.constant 0 : i32
    return %c0_i32, %c0_i32_0 : i32, i32
  }
}

module attributes {stable_mosaic.version = 11 : i64} {
  func.func @_plane_y_stats_kernel(%arg0: i32, %arg1: memref<8x256xf32, #tpu.memory_space<vmem>>, %arg2: memref<8x1xf32, #tpu.memory_space<vmem>>, %arg3: memref<8x1xf32, #tpu.memory_space<vmem>>, %arg4: memref<8x1xf32, #tpu.memory_space<vmem>>, %arg5: memref<8x1xf32, #tpu.memory_space<vmem>>, %arg6: memref<8x1xf32, #tpu.memory_space<vmem>>, %arg7: memref<8x1xf32, #tpu.memory_space<vmem>>) attributes {dimension_semantics = [#tpu.dimension_semantics<arbitrary>], iteration_bounds = array<i64: 1>, scalar_prefetch = 0 : i64, scratch_operands = 2 : i64, tpu.core_type = #tpu.core_type<tc>, window_params = [{transform_indices = @transform_0, window_bounds = array<i64: 8, 256>}, {pipeline_mode = #tpu.pipeline_mode<synchronous>, transform_indices = @transform_1, window_bounds = array<i64: 8, 1>}, {pipeline_mode = #tpu.pipeline_mode<synchronous>, transform_indices = @transform_2, window_bounds = array<i64: 8, 1>}, {pipeline_mode = #tpu.pipeline_mode<synchronous>, transform_indices = @transform_3, window_bounds = array<i64: 8, 1>}, {pipeline_mode = #tpu.pipeline_mode<synchronous>, transform_indices = @transform_4, window_bounds = array<i64: 8, 1>}]} {
    %c0_i32 = arith.constant 0 : i32
    %0 = arith.cmpi eq, %arg0, %c0_i32 : i32
    %1 = arith.extui %0 : i1 to i32
    %c0_i32_0 = arith.constant 0 : i32
    %2 = arith.cmpi ne, %1, %c0_i32_0 : i32
    scf.if %2 {
      %cst_19 = arith.constant 0.000000e+00 : f32
      %28 = vector.broadcast %cst_19 : f32 to vector<8x1xf32>
      %c0_20 = arith.constant 0 : index
      %c0_21 = arith.constant 0 : index
      %29 = vector.load %arg6[%c0_20, %c0_21] : memref<8x1xf32, #tpu.memory_space<vmem>>, vector<8x1xf32>
      tpu.vector_store %arg6[%c0_20, %c0_21], %28 {strides = array<i32>} : memref<8x1xf32, #tpu.memory_space<vmem>>, vector<8x1xf32>,
      %cst_22 = arith.constant 0xFF800000 : f32
      %30 = vector.broadcast %cst_22 : f32 to vector<8x1xf32>
      %c0_23 = arith.constant 0 : index
      %c0_24 = arith.constant 0 : index
      %31 = vector.load %arg7[%c0_23, %c0_24] : memref<8x1xf32, #tpu.memory_space<vmem>>, vector<8x1xf32>
      tpu.vector_store %arg7[%c0_23, %c0_24], %30 {strides = array<i32>} : memref<8x1xf32, #tpu.memory_space<vmem>>, vector<8x1xf32>,
    } else {
    }
    %c0 = arith.constant 0 : index
    %c0_1 = arith.constant 0 : index
    %3 = vector.load %arg1[%c0, %c0_1] : memref<8x256xf32, #tpu.memory_space<vmem>>, vector<8x256xf32>
    %c0_2 = arith.constant 0 : index
    %c0_3 = arith.constant 0 : index
    %4 = vector.load %arg2[%c0_2, %c0_3] : memref<8x1xf32, #tpu.memory_space<vmem>>, vector<8x1xf32>
    %5 = vector.broadcast %4 : vector<8x1xf32> to vector<8x256xf32>
    %6 = arith.mulf %3, %5 : vector<8x256xf32>
    %c0_4 = arith.constant 0 : index
    %c0_5 = arith.constant 0 : index
    %7 = vector.load %arg3[%c0_4, %c0_5] : memref<8x1xf32, #tpu.memory_space<vmem>>, vector<8x1xf32>
    %8 = vector.broadcast %7 : vector<8x1xf32> to vector<8x256xf32>
    %9 = arith.addf %6, %8 : vector<8x256xf32>
    %cst = arith.constant 0.000000e+00 : f32
    %10 = vector.broadcast %cst : f32 to vector<8x256xf32>
    %11 = arith.cmpf oge, %9, %10 : vector<8x256xf32>
    %cst_6 = arith.constant 0.00999999977 : f32
    %12 = vector.broadcast %cst_6 : f32 to vector<8x256xf32>
    %13 = arith.mulf %12, %9 : vector<8x256xf32>
    %14 = arith.select %11, %9, %13 : vector<8x256xi1>, vector<8x256xf32>
    %c0_7 = arith.constant 0 : index
    %c0_8 = arith.constant 0 : index
    %15 = vector.load %arg6[%c0_7, %c0_8] : memref<8x1xf32, #tpu.memory_space<vmem>>, vector<8x1xf32>
    %cst_9 = arith.constant dense<0.000000e+00> : vector<8xf32>
    %16 = vector.multi_reduction <add>, %14, %cst_9 [1] : vector<8x256xf32> to vector<8xf32>
    %17 = vector.shape_cast %16 : vector<8xf32> to vector<8x1xf32>
    %18 = arith.addf %15, %17 : vector<8x1xf32>
    %c0_10 = arith.constant 0 : index
    %c0_11 = arith.constant 0 : index
    %19 = vector.load %arg6[%c0_10, %c0_11] : memref<8x1xf32, #tpu.memory_space<vmem>>, vector<8x1xf32>
    tpu.vector_store %arg6[%c0_10, %c0_11], %18 {strides = array<i32>} : memref<8x1xf32, #tpu.memory_space<vmem>>, vector<8x1xf32>,
    %c0_12 = arith.constant 0 : index
    %c0_13 = arith.constant 0 : index
    %20 = vector.load %arg7[%c0_12, %c0_13] : memref<8x1xf32, #tpu.memory_space<vmem>>, vector<8x1xf32>
    %cst_14 = arith.constant dense<0xFF800000> : vector<8xf32>
    %21 = vector.multi_reduction <maximumf>, %14, %cst_14 [1] : vector<8x256xf32> to vector<8xf32>
    %22 = vector.shape_cast %21 : vector<8xf32> to vector<8x1xf32>
    %23 = arith.maximumf %20, %22 : vector<8x1xf32>
    %c0_15 = arith.constant 0 : index
    %c0_16 = arith.constant 0 : index
    %24 = vector.load %arg7[%c0_15, %c0_16] : memref<8x1xf32, #tpu.memory_space<vmem>>, vector<8x1xf32>
    tpu.vector_store %arg7[%c0_15, %c0_16], %23 {strides = array<i32>} : memref<8x1xf32, #tpu.memory_space<vmem>>, vector<8x1xf32>,
    %c0_i32_17 = arith.constant 0 : i32
    %25 = arith.cmpi eq, %arg0, %c0_i32_17 : i32
    %26 = arith.extui %25 : i1 to i32
    %c0_i32_18 = arith.constant 0 : i32
    %27 = arith.cmpi ne, %26, %c0_i32_18 : i32
    scf.if %27 {
      %c0_19 = arith.constant 0 : index
      %c0_20 = arith.constant 0 : index
      %28 = vector.load %arg6[%c0_19, %c0_20] : memref<8x1xf32, #tpu.memory_space<vmem>>, vector<8x1xf32>
      %c0_21 = arith.constant 0 : index
      %c0_22 = arith.constant 0 : index
      %29 = vector.load %arg4[%c0_21, %c0_22] : memref<8x1xf32, #tpu.memory_space<vmem>>, vector<8x1xf32>
      tpu.vector_store %arg4[%c0_21, %c0_22], %28 {strides = array<i32>} : memref<8x1xf32, #tpu.memory_space<vmem>>, vector<8x1xf32>,
      %c0_23 = arith.constant 0 : index
      %c0_24 = arith.constant 0 : index
      %30 = vector.load %arg7[%c0_23, %c0_24] : memref<8x1xf32, #tpu.memory_space<vmem>>, vector<8x1xf32>
      %c0_25 = arith.constant 0 : index
      %c0_26 = arith.constant 0 : index
      %31 = vector.load %arg5[%c0_25, %c0_26] : memref<8x1xf32, #tpu.memory_space<vmem>>, vector<8x1xf32>
      tpu.vector_store %arg5[%c0_25, %c0_26], %30 {strides = array<i32>} : memref<8x1xf32, #tpu.memory_space<vmem>>, vector<8x1xf32>,
    } else {
    }
    return
  }
  func.func @transform_0(%arg0: i32) -> (i32, i32) {
    %c0_i32 = arith.constant 0 : i32
    %c0_i32_0 = arith.constant 0 : i32
    return %c0_i32, %arg0 : i32, i32
  }
  func.func @transform_1(%arg0: i32) -> (i32, i32) {
    %c0_i32 = arith.constant 0 : i32
    %c0_i32_0 = arith.constant 0 : i32
    %c0_i32_1 = arith.constant 0 : i32
    return %c0_i32, %c0_i32_0 : i32, i32
  }
  func.func @transform_2(%arg0: i32) -> (i32, i32) {
    %c0_i32 = arith.constant 0 : i32
    %c0_i32_0 = arith.constant 0 : i32
    %c0_i32_1 = arith.constant 0 : i32
    return %c0_i32, %c0_i32_0 : i32, i32
  }
  func.func @transform_3(%arg0: i32) -> (i32, i32) {
    %c0_i32 = arith.constant 0 : i32
    %c0_i32_0 = arith.constant 0 : i32
    %c0_i32_1 = arith.constant 0 : i32
    return %c0_i32, %c0_i32_0 : i32, i32
  }
  func.func @transform_4(%arg0: i32) -> (i32, i32) {
    %c0_i32 = arith.constant 0 : i32
    %c0_i32_0 = arith.constant 0 : i32
    %c0_i32_1 = arith.constant 0 : i32
    return %c0_i32, %c0_i32_0 : i32, i32
  }
}

module attributes {stable_mosaic.version = 11 : i64} {
  func.func @_bias_add_kernel(%arg0: i32, %arg1: memref<8x256xf32, #tpu.memory_space<vmem>>, %arg2: memref<8x1xf32, #tpu.memory_space<vmem>>, %arg3: memref<8x256xf32, #tpu.memory_space<vmem>>) attributes {dimension_semantics = [#tpu.dimension_semantics<parallel>], iteration_bounds = array<i64: 1>, scalar_prefetch = 0 : i64, scratch_operands = 0 : i64, tpu.core_type = #tpu.core_type<tc>, window_params = [{transform_indices = @transform_0, window_bounds = array<i64: 8, 256>}, {pipeline_mode = #tpu.pipeline_mode<synchronous>, transform_indices = @transform_1, window_bounds = array<i64: 8, 1>}, {transform_indices = @transform_2, window_bounds = array<i64: 8, 256>}]} {
    %c0 = arith.constant 0 : index
    %c0_0 = arith.constant 0 : index
    %0 = vector.load %arg1[%c0, %c0_0] : memref<8x256xf32, #tpu.memory_space<vmem>>, vector<8x256xf32>
    %c0_1 = arith.constant 0 : index
    %c0_2 = arith.constant 0 : index
    %1 = vector.load %arg2[%c0_1, %c0_2] : memref<8x1xf32, #tpu.memory_space<vmem>>, vector<8x1xf32>
    %2 = vector.broadcast %1 : vector<8x1xf32> to vector<8x256xf32>
    %3 = arith.addf %0, %2 : vector<8x256xf32>
    %c0_3 = arith.constant 0 : index
    %c0_4 = arith.constant 0 : index
    %4 = vector.load %arg3[%c0_3, %c0_4] : memref<8x256xf32, #tpu.memory_space<vmem>>, vector<8x256xf32>
    tpu.vector_store %arg3[%c0_3, %c0_4], %3 {strides = array<i32>} : memref<8x256xf32, #tpu.memory_space<vmem>>, vector<8x256xf32>,
    return
  }
  func.func @transform_0(%arg0: i32) -> (i32, i32) {
    %c0_i32 = arith.constant 0 : i32
    %c0_i32_0 = arith.constant 0 : i32
    return %c0_i32, %arg0 : i32, i32
  }
  func.func @transform_1(%arg0: i32) -> (i32, i32) {
    %c0_i32 = arith.constant 0 : i32
    %c0_i32_0 = arith.constant 0 : i32
    %c0_i32_1 = arith.constant 0 : i32
    return %c0_i32, %c0_i32_0 : i32, i32
  }
  func.func @transform_2(%arg0: i32) -> (i32, i32) {
    %c0_i32 = arith.constant 0 : i32
    %c0_i32_0 = arith.constant 0 : i32
    return %c0_i32, %arg0 : i32, i32
  }
}

</mosaic_0001>

<bundles_post_ra>
// kernel: tile.18
= control target key start
LH: loop header
LB: loop body
LE: loop exit
PB: predicated region body
PF: predicated region fallthrough
CT: control target
= control target key end

     0   :  { %s22_s0 = inlined_call_operand.vmem [shape: f32[4], index: 0, kind: input, shape index: {}]   ;;  %s23_s1 = inlined_call_operand.vmem [shape: f32[2,4], index: 1, kind: output, shape index: {}]  }
   0x1   :  { %v4_v0 = vld [vmem:[%s22_s0] ss:$0 sm:$0xff] }
   0x2   :  { %5 = vst [vmem:[%s23_s1] sm:$0x3] %v4_v0 }

// kernel: tile.0
= control target key start
LH: loop header
LB: loop body
LE: loop exit
PB: predicated region body
PF: predicated region fallthrough
CT: control target
= control target key end

     0   :  { %s35_s8 = smov 125   ;;  %vm8_vm0 = vcmask 7168   ;;  %s36_s11 = smov 126   ;;  %s62_s0 = inlined_call_operand.vmem [shape: f32[2,4], index: 0, kind: input, shape index: {}]   ;;  %s63_s1 = inlined_call_operand.vmem [shape: f32[8,1], index: 1, kind: output, shape index: {}]  }
   0x1   :  { %v5_v0 = vld [vmem:[%s62_s0] sm:$0x3]  ;;  %s34_s0 = smov 127  }
   0x2   :  { %6 = vst [vmem:[#allocation0] sm:$0x3] %v5_v0 }
   0x9   :  { %v10_v1 = vld [vmem:[#allocation0] sm:$0x3]  }
   0xa   :  { %v22_v2 = vld [vmem:[#allocation0] sm:$0x3]   ;;  %11 = vrot.lane.b32.xlu0 %v10_v1, %s34_s0 }
   0xb   :  { %23 = vrot.lane.b32.xlu1 %v22_v2, %s35_s8  ;;  %v7_v3 = vld [vmem:[#allocation0] sm:$0x3]  }
   0xc   :  { %v16_v4 = vld [vmem:[#allocation0] sm:$0x3]   ;;  %9 = vst.msk [vmem:[%s63_s1] ss:$4 sm:$0x3] %vm8_vm0, %v7_v3  }
   0xe   :  { %17 = vrot.lane.b32.xlu0 %v16_v4, %s36_s11 }
  0x7c   :  { %v12_v5 = vpop.permute.xlu0 %11  }
  0x7d   :  { %v24_v6 = vpop.permute.xlu1 %23   ;;  %28 = vst.msk [vmem:[%s63_s1 + $0x1] ss:$4 sm:$0x3] %vm8_vm0, %v12_v5  }
  0x7e   :  { %30 = vst.msk [vmem:[%s63_s1 + $0x3] ss:$4 sm:$0x3] %vm8_vm0, %v24_v6  }
  0x80   :  { %v18_v7 = vpop.permute.xlu0 %17  }
  0x81   :  { %29 = vst.msk [vmem:[%s63_s1 + $0x2] ss:$4 sm:$0x3] %vm8_vm0, %v18_v7  }

// kernel: global_bias_block.3
= control target key start
LH: loop header
LB: loop body
LE: loop exit
PB: predicated region body
PF: predicated region fallthrough
CT: control target
= control target key end

     0   :  { %vm14_vm0 = vcmask 7168   ;;  %v50_v2 = vmov 0.0   ;;  %s84_s0 = inlined_call_operand.vmem [shape: f32[8,256], index: 0, kind: input, shape index: {}]   ;;  %s85_s1 = inlined_call_operand.vmem [shape: f32[8,1], index: 1, kind: output, shape index: {0}]   ;;  %s86_s2 = inlined_call_operand.vmem [shape: f32[8,1], index: 2, kind: output, shape index: {1}]  }
   0x1   :  { %v17_v0 = vld [vmem:[%s84_s0] sm:$0xff]  ;;  %v18_v1 = vld [vmem:[%s84_s0 + $0x8] sm:$0xff]  ;;  %15 = vst.msk [vmem:[#allocation2] sm:$0xff] %vm14_vm0, %v50_v2  ;;  %16 = vst.msk [vmem:[#allocation3] sm:$0xff] %vm14_vm0, %v50_v2 }
   0x2   :  { %v20_v3 = vadd.f32 %v18_v1, %v17_v0  ;;  %v27_v4 = vmul.f32 %v17_v0, %v17_v0  ;;  %v28_v5 = vmul.f32 %v18_v1, %v18_v1 }
   0x4   :  { %21 = vadd.xlane.f32.xlu0 %v20_v3  ;;  %v29_v6 = vadd.f32 %v28_v5, %v27_v4 }
   0x8   :  { %30 = vadd.xlane.f32.xlu0 %v29_v6  ;;  %v19_v7 = vld [vmem:[#allocation2] sm:$0xff]  ;;  %v26_v10 = vld [vmem:[#allocation3] sm:$0xff] }
  0x8d   :  { %v22_v8 = vpop.xlane.xlu0 %21 }
  0x8e   :  { %v23_v9 = vadd.f32 %v22_v8, %v19_v7 }
  0x90   :  { %25 = vst.msk [vmem:[#allocation2] sm:$0xff] %vm14_vm0, %v23_v9 }
  0x91   :  { %v31_v11 = vpop.xlane.xlu0 %30 }
  0x92   :  { %v32_v12 = vadd.f32 %v31_v11, %v26_v10 }
  0x94   :  { %33 = vst.msk [vmem:[#allocation3] sm:$0xff] %vm14_vm0, %v32_v12 }
  0x97   :  { %v37_v13 = vld [vmem:[#allocation2] sm:$0xff] }
  0x98   :  { %38 = vst.msk [vmem:[%s85_s1] sm:$0xff] %vm14_vm0, %v37_v13 }
  0x9b   :  { %v39_v14 = vld [vmem:[#allocation3] sm:$0xff] }
  0x9c   :  { %40 = vst.msk [vmem:[%s86_s2] sm:$0xff] %vm14_vm0, %v39_v14 }

// kernel: global_bias_block.5
= control target key start
LH: loop header
LB: loop body
LE: loop exit
PB: predicated region body
PF: predicated region fallthrough
CT: control target
= control target key end

     0   :  { %v29_v0 = vmov 0   ;;  %s60_s1 = inlined_call_operand.vmem [shape: f32[8,1], index: 1, kind: input, shape index: {}]   ;;  %s61_s0 = inlined_call_operand.vmem [shape: f32[8,256], index: 0, kind: input, shape index: {}]   ;;  %s62_s2 = inlined_call_operand.vmem [shape: f32[8,256], index: 2, kind: output, shape index: {}]  }
   0x1   :  { %28 = vset.pattern.permute.xlu0 %v29_v0  ;;  %v13_v1 = vld [vmem:[%s60_s1] sm:$0xff]  ;;  %v12_v3 = vld [vmem:[%s61_s0 + $0x8] sm:$0xff] }
   0x2   :  { %16 = vperm.xlu0 %28, %v13_v1   ;;  %v11_v2 = vld [vmem:[%s61_s0] sm:$0xff] }
  0x7d   :  { %v17_v4 = vpop.permute.xlu0 %16 }
  0x7e   :  { %v19_v5 = vadd.f32 %v17_v4, %v11_v2  ;;  %v20_v6 = vadd.f32 %v17_v4, %v12_v3 }
  0x80   :  { %21 = vst [vmem:[%s62_s2] sm:$0xff] %v19_v5  ;;  %22 = vst [vmem:[%s62_s2 + $0x8] sm:$0xff] %v20_v6 }

// kernel: global_bias_block.4
= control target key start
LH: loop header
LB: loop body
LE: loop exit
PB: predicated region body
PF: predicated region fallthrough
CT: control target
= control target key end

     0   :  { %v79_v0 = vmov 0   ;;  %vm20_vm0 = vcmask 7168   ;;  %v80_v3 = vmov 0.0   ;;  %v81_v18 = vmov -inf   ;;  %s131_s1 = inlined_call_operand.vmem [shape: f32[8,1], index: 1, kind: input, shape index: {}]   ;;  %s132_s2 = inlined_call_operand.vmem [shape: f32[8,1], index: 2, kind: input, shape index: {}]   ;;  %s133_s0 = inlined_call_operand.vmem [shape: f32[8,256], index: 0, kind: input, shape index: {}]   ;;  %s134_s3 = inlined_call_operand.vmem [shape: f32[8,1], index: 3, kind: output, shape index: {0}]   ;;  %s135_s4 = inlined_call_operand.vmem [shape: f32[8,1], index: 4, kind: output, shape index: {1}]  }
   0x1   :  { %78 = vset.pattern.permute.xlu0 %v79_v0  ;;  %v25_v1 = vld [vmem:[%s131_s1] sm:$0xff]  ;;  %21 = vst.msk [vmem:[#allocation2] sm:$0xff] %vm20_vm0, %v80_v3  ;;  %v24_v6 = vld [vmem:[%s133_s0 + $0x8] sm:$0xff]  ;;  %22 = vst.msk [vmem:[#allocation3] sm:$0xff] %vm20_vm0, %v81_v18 }
   0x2   :  { %28 = vperm.xlu0 %78, %v25_v1   ;;  %v33_v2 = vld [vmem:[%s132_s2] sm:$0xff] }
   0x3   :  { %v23_v5 = vld [vmem:[%s133_s0] sm:$0xff] }
   0x6   :  { %36 = vperm.xlu0 %78, %v33_v2  }
   0x8   :  { %v47_v19 = vld [vmem:[#allocation2] sm:$0xff]  ;;  %v54_v22 = vld [vmem:[#allocation3] sm:$0xff] }
  0x7d   :  { %v29_v4 = vpop.permute.xlu0 %28 }
  0x7e   :  { %v31_v7 = vmul.f32 %v29_v4, %v23_v5  ;;  %v32_v8 = vmul.f32 %v29_v4, %v24_v6 }
  0x81   :  { %v37_v9 = vpop.permute.xlu0 %36 }
  0x82   :  { %v39_v10 = vadd.f32 %v37_v9, %v31_v7  ;;  %v40_v11 = vadd.f32 %v37_v9, %v32_v8 }
  0x84   :  { %v43_v12 = vmul.f32 0.01, %v39_v10  ;;  %v44_v13 = vmul.f32 0.01, %v40_v11  ;;  %vm41_vm1 = vcmp.ge.f32.partialorder %v39_v10, 0.0  ;;  %vm42_vm2 = vcmp.ge.f32.partialorder %v40_v11, 0.0 }
  0x86   :  { %v45_v14 = vsel %vm41_vm1, %v39_v10, %v43_v12  ;;  %v46_v15 = vsel %vm42_vm2, %v40_v11, %v44_v13 }
  0x87   :  { %v48_v16 = vadd.f32 %v46_v15, %v45_v14  ;;  %v55_v17 = vmax.f32 %v45_v14, %v46_v15 }
  0x89   :  { %49 = vadd.xlane.f32.xlu1 %v48_v16 }
  0x8d   :  { %56 = vmax.xlane.f32.xlu1 %v55_v17 }
 0x112   :  { %v50_v20 = vpop.xlane.xlu1 %49 }
 0x113   :  { %v51_v21 = vadd.f32 %v50_v20, %v47_v19 }
 0x115   :  { %53 = vst.msk [vmem:[#allocation2] sm:$0xff] %vm20_vm0, %v51_v21 }
 0x116   :  { %v57_v23 = vpop.xlane.xlu1 %56 }
 0x117   :  { %v58_v24 = vmax.f32 %v54_v22, %v57_v23 }
 0x119   :  { %59 = vst.msk [vmem:[#allocation3] sm:$0xff] %vm20_vm0, %v58_v24 }
 0x11c   :  { %v63_v25 = vld [vmem:[#allocation2] sm:$0xff] }
 0x11d   :  { %64 = vst.msk [vmem:[%s134_s3] sm:$0xff] %vm20_vm0, %v63_v25 }
 0x120   :  { %v65_v26 = vld [vmem:[#allocation3] sm:$0xff] }
 0x121   :  { %66 = vst.msk [vmem:[%s135_s4] sm:$0xff] %vm20_vm0, %v65_v26 }

</bundles_post_ra>
